<compile_context>
chip_gen: v5e
topology: v5e:2x2
jax: 0.10.0
libtpu: 0.0.40
codegen_flags: <defaults>
</compile_context>

<pallas_src>
import functools

import jax
import jax.numpy as jnp
from jax.experimental import pallas as pl
from jax.experimental.pallas import tpu as pltpu


def _round_up(n, m):
    return ((n + m - 1) // m) * m


def _vmem_limit_bytes():
    """Scoped-VMEM budget: physical minus headroom, clamped to [32, 96] MiB."""
    phys = 64 * 1024 * 1024
    try:
        phys = int(pltpu.get_tpu_info().vmem_capacity_bytes)
    except Exception:
        pass  # conservative fallback works on every generation
    return int(min(max(phys - 16 * 1024 * 1024, 32 * 1024 * 1024),
                   96 * 1024 * 1024))


def _largest_aligned_divisor(n_pad, cap):
    """Largest multiple of 256 that divides n_pad and is <= cap (min 256)."""
    d = min(cap, n_pad) // 256
    while d > 1:
        if n_pad % (d * 256) == 0:
            return d * 256
        d -= 1
    return 256


def _pick_tiles(n_pad):
    """MXU/HBM-friendly tiles: large tm/tk that divide the padded N."""
    tk = _largest_aligned_divisor(n_pad, 2048)   # reduction tile
    tm = _largest_aligned_divisor(n_pad, 1024)   # row tile
    # Keep >= 2 row tiles when possible so the "parallel" axis can shard
    # across v7x's two TensorCores (no effect on single-TC v5e/v6e).
    if n_pad // tm < 2 and n_pad >= 512:
        tm = _largest_aligned_divisor(n_pad, tm // 2)
    return tm, tk


# ----------------------------- Pallas kernel --------------------------------

def _hk_layer_kernel(h_ref, z_ref, b_ref, o_ref,
                     *, tk, z_resident, epilogue, c_valid):
    """grid = (row_tiles, k_tiles): o += H_tile @ z_tile; fused epilogue."""
    k = pl.program_id(1)

    @pl.when(k == 0)
    def _init():
        o_ref[...] = jnp.zeros_like(o_ref)

    if z_resident:
        # z fully VMEM-resident: slice the k-th aligned (tk, c_out) chunk.
        z_blk = z_ref[pl.ds(pl.multiple_of(k * tk, tk), tk), :]
    else:
        # z streamed per (i, k) grid step.
        z_blk = z_ref[...]

    o_ref[...] += jnp.dot(h_ref[...], z_blk,
                          preferred_element_type=jnp.float32)

    @pl.when(k == pl.num_programs(1) - 1)
    def _epilogue():
        out = o_ref[...] + b_ref[...]
        if epilogue == "relu":
            out = jnp.maximum(out, 0.0)
        elif epilogue == "log_softmax":
            # Masked log-softmax over the real (unpadded) channels only.
            col = jax.lax.broadcasted_iota(jnp.int32, out.shape, 1)
            valid = col < c_valid
            zm = jnp.where(valid, out, -1e30)
            m = jnp.max(zm, axis=1, keepdims=True)
            e = jnp.where(valid, jnp.exp(zm - m), 0.0)
            lse = jnp.log(jnp.sum(e, axis=1, keepdims=True))
            out = jnp.where(valid, zm - m - lse, 0.0)
        o_ref[...] = out.astype(o_ref.dtype)


def hk_layer(H_bf16, z_pad, b_pad, *, epilogue, c_valid, vmem_limit):
    """One HeatKernelLayer core: epilogue(H @ z + b) on padded operands."""
    n_pad, c_out_pad = z_pad.shape
    tm, tk = _pick_tiles(n_pad)
    grid = (n_pad // tm, n_pad // tk)

    # Keep z resident only while it is a small fraction of the VMEM budget
    # (counting double-buffering); otherwise stream it per k-tile.
    z_resident = (2 * n_pad * c_out_pad * 2) <= vmem_limit // 4

    kernel = functools.partial(_hk_layer_kernel, tk=tk, z_resident=z_resident,
                               epilogue=epilogue, c_valid=c_valid)

    if z_resident:
        z_spec = pl.BlockSpec((n_pad, c_out_pad), lambda i, k: (0, 0))
        z_bytes = n_pad * c_out_pad * 2
    else:
        z_spec = pl.BlockSpec((tk, c_out_pad), lambda i, k: (k, 0))
        z_bytes = (n_pad // tm) * n_pad * c_out_pad * 2

    flops = 2 * n_pad * n_pad * c_out_pad
    transcendentals = n_pad * c_out_pad if epilogue == "log_softmax" else 0
    bytes_accessed = (n_pad * n_pad * 2          # H (bf16), the only big stream
                      + z_bytes                  # z (bf16)
                      + 4 * c_out_pad            # bias (f32)
                      + n_pad * c_out_pad * 4)   # output (f32)

    return pl.pallas_call(
        kernel,
        out_shape=jax.ShapeDtypeStruct((n_pad, c_out_pad), jnp.float32),
        grid_spec=pltpu.PrefetchScalarGridSpec(
            num_scalar_prefetch=0,
            grid=grid,
            in_specs=[
                # H: streamed (tm, tk) tiles — HBM-roofline bound operand.
                pl.BlockSpec((tm, tk), lambda i, k: (i, k)),
                z_spec,
                pl.BlockSpec((1, c_out_pad), lambda i, k: (0, 0)),
            ],
            # Output block is resident across the k reduction => accumulator.
            out_specs=pl.BlockSpec((tm, c_out_pad), lambda i, k: (i, 0)),
        ),
        compiler_params=pltpu.CompilerParams(
            dimension_semantics=("parallel", "arbitrary"),
            vmem_limit_bytes=vmem_limit,
        ),
        cost_estimate=pl.CostEstimate(
            flops=flops, transcendentals=transcendentals,
            bytes_accessed=bytes_accessed),
    )(H_bf16, z_pad, b_pad)


# ------------------------------- JAX glue ------------------------------------

def build_heat_kernel(N, edge_index, edge_weight, t):
    """Dense normalized Laplacian + matrix exponential (graph preprocessing)."""
    if edge_weight is None:
        edge_weight = jnp.ones((edge_index.shape[1],), dtype=jnp.float32)
    adj = jnp.zeros((N, N), dtype=jnp.float32).at[
        edge_index[0], edge_index[1]].add(edge_weight)
    deg = adj.sum(axis=1)
    deg_inv_sqrt = jnp.where(deg > 0.0,
                             jax.lax.rsqrt(jnp.maximum(deg, 1e-30)), 0.0)
    A_norm = deg_inv_sqrt[:, None] * adj * deg_inv_sqrt[None, :]
    L = jnp.eye(N, dtype=jnp.float32) - A_norm
    # TODO(synk): torch.matrix_exp (Pade + scaling/squaring) has no clean Pallas
    # equivalent; computed with jax.scipy.linalg.expm in the XLA glue.
    H = jax.scipy.linalg.expm(-t * L)
    return H.astype(jnp.float32)


def init_params(key, dims):
    """Deterministic nn.Linear-style init: U(-1/sqrt(fan_in), 1/sqrt(fan_in))."""
    params = []
    for c_in, c_out in zip(dims[:-1], dims[1:]):
        key, kw, kb = jax.random.split(key, 3)
        bound = 1.0 / (c_in ** 0.5)
        w = jax.random.uniform(kw, (c_in, c_out), jnp.float32, -bound, bound)
        b = jax.random.uniform(kb, (c_out,), jnp.float32, -bound, bound)
        params.append((w, b))
    return params


def hkgcn_forward(x, edge_index, params, t=1.0):
    N, _ = x.shape
    c_out_final = params[-1][0].shape[1]

    # Heat kernel built once in f32 XLA, padded once, cast once to bf16.
    H = build_heat_kernel(N, edge_index, None, t)
    n_pad = _round_up(max(N, 1), 256)
    H_bf16 = jnp.pad(H, ((0, n_pad - N), (0, n_pad - N))).astype(jnp.bfloat16)

    vmem_limit = _vmem_limit_bytes()

    # Activations carried in f32 with padded rows (padding rows/cols of H are
    # zero, so they never contaminate real rows).
    act = jnp.pad(x, ((0, n_pad - N), (0, 0))).astype(jnp.float32)

    n_layers = len(params)
    for i, (w, b) in enumerate(params):
        _, co = w.shape
        co_pad = _round_up(co, 128)
        # Reassociation: z = x @ W computed as a tiny f32 XLA matmul, so the
        # Pallas kernel is purely H @ z (+ fused bias/activation).
        z = act @ w                                           # (n_pad, co) f32
        z_pad = jnp.pad(z, ((0, 0), (0, co_pad - co))).astype(jnp.bfloat16)
        b_pad = jnp.pad(b, (0, co_pad - co)).astype(jnp.float32).reshape(1, co_pad)
        is_last = i == n_layers - 1
        out = hk_layer(
            H_bf16, z_pad, b_pad,
            epilogue="log_softmax" if is_last else "relu",
            c_valid=co,
            vmem_limit=vmem_limit,
        )
        act = out[:, :co]
        # TODO(synk): F.dropout treated as identity (inference / training=False).
    return act[:N, :c_out_final]


# --------------------------------- main ---------------------------------------

if __name__ == "__main__":
    key = jax.random.PRNGKey(0)

    # Small shapes implied by the forward: N nodes with C features, graph edges.
    N = 8                # number of graph nodes
    E = 16               # number of edges
    in_channels = 4
    hidden_channels = 32
    out_channels = 8
    num_layers = 2       # -> layers: [in->hidden, hidden->out]
    t = 1.0

    k_x, k_src, k_dst, k_param = jax.random.split(key, 4)
    x = jax.random.normal(k_x, (N, in_channels), dtype=jnp.float32)
    src = jax.random.randint(k_src, (E,), 0, N)
    dst = jax.random.randint(k_dst, (E,), 0, N)
    edge_index = jnp.stack([src, dst], axis=0)  # (2, E)

    dims = [in_channels] + [hidden_channels] * (num_layers - 1) + [out_channels]
    params = init_params(k_param, dims)

    out = hkgcn_forward(x, edge_index, params, t=t)
    out = jax.block_until_ready(out)

    assert out.shape == (N, out_channels)
    assert bool(jnp.all(jnp.isfinite(out)))
    print("KERNEL_OK")
</pallas_src>

<mosaic_0001>
module attributes {stable_mosaic.version = 11 : i64} {
  func.func @_hk_layer_kernel(%arg0: i32, %arg1: i32, %arg2: memref<256x256xbf16, #tpu.memory_space<vmem>>, %arg3: memref<256x128xbf16, #tpu.memory_space<vmem>>, %arg4: memref<1x128xf32, #tpu.memory_space<vmem>>, %arg5: memref<256x128xf32, #tpu.memory_space<vmem>>) attributes {dimension_semantics = [#tpu.dimension_semantics<parallel>, #tpu.dimension_semantics<arbitrary>], iteration_bounds = array<i64: 1, 1>, scalar_prefetch = 0 : i64, scratch_operands = 0 : i64, tpu.core_type = #tpu.core_type<tc>, window_params = [{transform_indices = @transform_0, window_bounds = array<i64: 256, 256>}, {pipeline_mode = #tpu.pipeline_mode<synchronous>, transform_indices = @transform_1, window_bounds = array<i64: 256, 128>}, {pipeline_mode = #tpu.pipeline_mode<synchronous>, transform_indices = @transform_2, window_bounds = array<i64: 1, 128>}, {transform_indices = @transform_3, window_bounds = array<i64: 256, 128>}]} {
    %c0_i32 = arith.constant 0 : i32
    %0 = arith.cmpi eq, %arg1, %c0_i32 : i32
    %1 = arith.extui %0 : i1 to i32
    %c0_i32_0 = arith.constant 0 : i32
    %2 = arith.cmpi ne, %1, %c0_i32_0 : i32
    scf.if %2 {
      %cst_9 = arith.constant 0.000000e+00 : f32
      %15 = vector.broadcast %cst_9 : f32 to vector<256x128xf32>
      %c0_10 = arith.constant 0 : index
      %c0_11 = arith.constant 0 : index
      %16 = vector.load %arg5[%c0_10, %c0_11] : memref<256x128xf32, #tpu.memory_space<vmem>>, vector<256x128xf32>
      tpu.vector_store %arg5[%c0_10, %c0_11], %15 {strides = array<i32>} : memref<256x128xf32, #tpu.memory_space<vmem>>, vector<256x128xf32>,
    } else {
    }
    %c256_i32 = arith.constant 256 : i32
    %3 = arith.muli %arg1, %c256_i32 : i32
    %4 = tpu.assume_multiple %3, 256 : i32
    %5 = arith.index_cast %4 : i32 to index
    %c0 = arith.constant 0 : index
    %6 = vector.load %arg3[%5, %c0] : memref<256x128xbf16, #tpu.memory_space<vmem>>, vector<256x128xbf16>
    %c0_1 = arith.constant 0 : index
    %c0_2 = arith.constant 0 : index
    %7 = vector.load %arg5[%c0_1, %c0_2] : memref<256x128xf32, #tpu.memory_space<vmem>>, vector<256x128xf32>
    %c0_3 = arith.constant 0 : index
    %c0_4 = arith.constant 0 : index
    %8 = vector.load %arg2[%c0_3, %c0_4] : memref<256x256xbf16, #tpu.memory_space<vmem>>, vector<256x256xbf16>
    %cst = arith.constant dense<0.000000e+00> : vector<256x128xf32>
    %9 = tpu.matmul %8, %6, %cst {dimension_numbers = #tpu.dot_dimension_numbers<[1], [0], [0], [1], [0, 0, 1, 1], [], []>} : vector<256x256xbf16>, vector<256x128xbf16>, vector<256x128xf32> -> vector<256x128xf32>
    %10 = arith.addf %7, %9 : vector<256x128xf32>
    %c0_5 = arith.constant 0 : index
    %c0_6 = arith.constant 0 : index
    %11 = vector.load %arg5[%c0_5, %c0_6] : memref<256x128xf32, #tpu.memory_space<vmem>>, vector<256x128xf32>
    tpu.vector_store %arg5[%c0_5, %c0_6], %10 {strides = array<i32>} : memref<256x128xf32, #tpu.memory_space<vmem>>, vector<256x128xf32>,
    %c0_i32_7 = arith.constant 0 : i32
    %12 = arith.cmpi eq, %arg1, %c0_i32_7 : i32
    %13 = arith.extui %12 : i1 to i32
    %c0_i32_8 = arith.constant 0 : i32
    %14 = arith.cmpi ne, %13, %c0_i32_8 : i32
    scf.if %14 {
      %c0_9 = arith.constant 0 : index
      %c0_10 = arith.constant 0 : index
      %15 = vector.load %arg5[%c0_9, %c0_10] : memref<256x128xf32, #tpu.memory_space<vmem>>, vector<256x128xf32>
      %c0_11 = arith.constant 0 : index
      %c0_12 = arith.constant 0 : index
      %16 = vector.load %arg4[%c0_11, %c0_12] : memref<1x128xf32, #tpu.memory_space<vmem>>, vector<1x128xf32>
      %17 = vector.broadcast %16 : vector<1x128xf32> to vector<256x128xf32>
      %18 = arith.addf %15, %17 : vector<256x128xf32>
      %cst_13 = arith.constant 0.000000e+00 : f32
      %19 = vector.broadcast %cst_13 : f32 to vector<256x128xf32>
      %20 = arith.maximumf %18, %19 : vector<256x128xf32>
      %c0_14 = arith.constant 0 : index
      %c0_15 = arith.constant 0 : index
      %21 = vector.load %arg5[%c0_14, %c0_15] : memref<256x128xf32, #tpu.memory_space<vmem>>, vector<256x128xf32>
      tpu.vector_store %arg5[%c0_14, %c0_15], %20 {strides = array<i32>} : memref<256x128xf32, #tpu.memory_space<vmem>>, vector<256x128xf32>,
    } else {
    }
    return
  }
  func.func @transform_0(%arg0: i32, %arg1: i32) -> (i32, i32) {
    %c0_i32 = arith.constant 0 : i32
    return %arg0, %arg1 : i32, i32
  }
  func.func @transform_1(%arg0: i32, %arg1: i32) -> (i32, i32) {
    %c0_i32 = arith.constant 0 : i32
    %c0_i32_0 = arith.constant 0 : i32
    %c0_i32_1 = arith.constant 0 : i32
    return %c0_i32, %c0_i32_0 : i32, i32
  }
  func.func @transform_2(%arg0: i32, %arg1: i32) -> (i32, i32) {
    %c0_i32 = arith.constant 0 : i32
    %c0_i32_0 = arith.constant 0 : i32
    %c0_i32_1 = arith.constant 0 : i32
    return %c0_i32, %c0_i32_0 : i32, i32
  }
  func.func @transform_3(%arg0: i32, %arg1: i32) -> (i32, i32) {
    %c0_i32 = arith.constant 0 : i32
    %c0_i32_0 = arith.constant 0 : i32
    return %arg0, %c0_i32 : i32, i32
  }
}

</mosaic_0001>

<bundles_post_ra>
// kernel: tpu_custom_call.1
= control target key start
LH: loop header
LB: loop body
LE: loop exit
PB: predicated region body
PF: predicated region fallthrough
CT: control target
= control target key end

     0   :  { %8 = vsyncpa [#allocation3], 0  ;;  %s1261_s0 = inlined_call_operand.hbm [shape: bf16[256,256], index: 0, kind: input, shape index: {}]   ;;  %s1262_s1 = inlined_call_operand.hbm [shape: bf16[256,128], index: 1, kind: input, shape index: {}]   ;;  %s1263_s2 = inlined_call_operand.vmem [shape: f32[1,128], index: 2, kind: input, shape index: {}]   ;;  %s1264_s3 = inlined_call_operand.hbm [shape: f32[256,128], index: 3, kind: output, shape index: {}]  }
   0x1   :  { %9 = vsyncpa [#allocation6], 0 }
   0x2   :  { %10 = vsyncpa [#allocation4], 0  ;;  %s15_s14 = sshll.u32 %s1261_s0, 4  ;;  %s1182_s15 = smov [#allocation2]   ;;  %s16_s14 = int_to_ptr.hbm [resolvable:$true] %s15_s14 }
   0x3   :  { %s17_s16 = sshll.u32 %s1182_s15, 4  ;;  %s28_s19 = sshll.u32 %s1262_s1, 4  ;;  %s18_s16 = int_to_ptr.vmem [resolvable:$true] %s17_s16  ;;  %s29_s19 = int_to_ptr.hbm [resolvable:$true] %s28_s19 }
   0x4   :  { %s1183_s20 = smov 128   ;;  %s1184_s21 = smov 8  }
   0x5   :  { %23 = dma.hbm_to_vmem [thread:$0]  %s16_s14, 4096, %s18_s16, [#allocation3], %s1183_s20, %s1183_s20, %s1184_s21  }
   0x6   :  { %s1185_s22 = smov [#allocation5]   ;;  %s1186_s24 = smov 64  }
   0x7   :  { %s30_s23 = sshll.u32 %s1185_s22, 4  ;;  %s1187_s0 = smov 4   ;;  %s31_s23 = int_to_ptr.vmem [resolvable:$true] %s30_s23 }
   0x8   :  { %36 = dma.hbm_to_vmem [thread:$0]  %s29_s19, 2048, %s31_s23, [#allocation6], %s1186_s24, %s1186_s24, %s1187_s0  }
   0x9   :  { %1176 = dma.done.wait [#allocation3], 4096  }
   0xa   :  { %1177 = vsyncadd [#allocation3], 4294963200 }
   0xb   :  { %1178 = dma.done.wait [#allocation6], 2048  }
   0xc   :  { %1179 = vsyncadd [#allocation6], 4294965248  ;;  %v1038_v0 = vld [vmem:[#allocation5 + $0x38] sm:$0xff]  ;;  %v1037_v2 = vld [vmem:[#allocation5 + $0x30] sm:$0xff]  ;;  %s823_s29 = sshll.u32 %s1264_s3, 4  ;;  %s824_s29 = int_to_ptr.hbm [resolvable:$true] %s823_s29 }
   0xd   :  { %v1046_v1 = vld [vmem:[#allocation5 + $0x78] sm:$0xff]  ;;  %440 = vmatpush.bf16.msra.mxu0 %v1038_v0  ;;  %1079 = vmatpush.bf16.msra.mxu2 %v1038_v0  ;;  %v1045_v3 = vld [vmem:[#allocation5 + $0x70] sm:$0xff]  ;;  %v1036_v4 = vld [vmem:[#allocation5 + $0x28] sm:$0xff] }
   0xe   :  { %529 = vmatpush.bf16.msra.mxu1 %v1046_v1  ;;  %1087 = vmatpush.bf16.msra.mxu3 %v1046_v1  ;;  %v1044_v5 = vld [vmem:[#allocation5 + $0x68] sm:$0xff]  ;;  %v1035_v6 = vld [vmem:[#allocation5 + $0x20] sm:$0xff]  ;;  %v1034_v8 = vld [vmem:[#allocation5 + $0x18] sm:$0xff] }
   0xf   :  { %v1043_v7 = vld [vmem:[#allocation5 + $0x60] sm:$0xff]  ;;  %v1042_v9 = vld [vmem:[#allocation5 + $0x58] sm:$0xff]  ;;  %v1033_v10 = vld [vmem:[#allocation5 + $0x10] sm:$0xff] }
  0x10   :  { %v1041_v11 = vld [vmem:[#allocation5 + $0x50] sm:$0xff]  ;;  %v1032_v12 = vld [vmem:[#allocation5 + $0x8] sm:$0xff]  ;;  %v1031_v14 = vld [vmem:[#allocation5] sm:$0xff] }
  0x11   :  { %441 = vmatpush.bf16.msra.mxu0 %v1037_v2  ;;  %1080 = vmatpush.bf16.msra.mxu2 %v1037_v2  ;;  %v1040_v13 = vld [vmem:[#allocation5 + $0x48] sm:$0xff]  ;;  %v1039_v15 = vld [vmem:[#allocation5 + $0x40] sm:$0xff]  ;;  %v849_v28 = vld [vmem:[#allocation2 + $0x10] sm:$0xf] }
  0x12   :  { %530 = vmatpush.bf16.msra.mxu1 %v1045_v3  ;;  %1088 = vmatpush.bf16.msra.mxu3 %v1045_v3  ;;  %v841_v16 = vld [vmem:[#allocation2] sm:$0xf]  ;;  %v1048_v17 = vld [vmem:[#allocation2 + $0x4] sm:$0xf0]  ;;  %v1047_v20 = vld [vmem:[#allocation2 + $0x4] sm:$0xf] }
  0x13   :  { %v905_v18 = vld [vmem:[#allocation2 + $0x80] sm:$0xf]  ;;  %v1064_v19 = vld [vmem:[#allocation2 + $0x84] sm:$0xf0]  ;;  %v843_v21 = vld [vmem:[#allocation2 + $0x8] sm:$0xf0]  ;;  %v842_v24 = vor.u32 %v1048_v17, %v841_v16 }
  0x14   :  { %v1063_v22 = vld [vmem:[#allocation2 + $0x84] sm:$0xf]  ;;  %v907_v23 = vld [vmem:[#allocation2 + $0x88] sm:$0xf0]  ;;  %v906_v25 = vor.u32 %v1064_v19, %v905_v18  ;;  %v846_v26 = vor.u32 %v1047_v20, %v843_v21  ;;  %v1050_v29 = vld [vmem:[#allocation2 + $0x14] sm:$0xf0] }
  0x15   :  { %442 = vmatpush.bf16.msra.mxu0 %v1036_v4  ;;  %1081 = vmatpush.bf16.msra.mxu2 %v1036_v4  ;;  %v910_v27 = vor.u32 %v1063_v22, %v907_v23  ;;  %v913_v30 = vld [vmem:[#allocation2 + $0x90] sm:$0xf]  ;;  %v1066_v31 = vld [vmem:[#allocation2 + $0x94] sm:$0xf0]  ;;  %v1049_v32 = vld [vmem:[#allocation2 + $0x14] sm:$0xf]  ;;  %v850_v36 = vor.u32 %v1050_v29, %v849_v28 }
  0x16   :  { %531 = vmatpush.bf16.msra.mxu1 %v1044_v5  ;;  %1089 = vmatpush.bf16.msra.mxu3 %v1044_v5  ;;  %v851_v33 = vld [vmem:[#allocation2 + $0x18] sm:$0xf0]  ;;  %v1065_v34 = vld [vmem:[#allocation2 + $0x94] sm:$0xf]  ;;  %v914_v37 = vor.u32 %v1066_v31, %v913_v30  ;;  %v857_v40 = vld [vmem:[#allocation2 + $0x20] sm:$0xf] }
  0x17   :  { %v915_v35 = vld [vmem:[#allocation2 + $0x98] sm:$0xf0]  ;;  %v854_v38 = vor.u32 %v1049_v32, %v851_v33  ;;  %v1052_v41 = vld [vmem:[#allocation2 + $0x24] sm:$0xf0]  ;;  %v921_v42 = vld [vmem:[#allocation2 + $0xa0] sm:$0xf] }
  0x18   :  { %v918_v39 = vor.u32 %v1065_v34, %v915_v35  ;;  %v1068_v43 = vld [vmem:[#allocation2 + $0xa4] sm:$0xf0]  ;;  %v1051_v44 = vld [vmem:[#allocation2 + $0x24] sm:$0xf]  ;;  %v859_v45 = vld [vmem:[#allocation2 + $0x28] sm:$0xf0]  ;;  %v858_v48 = vor.u32 %v1052_v41, %v857_v40 }
  0x19   :  { %443 = vmatpush.bf16.msra.mxu0 %v1035_v6  ;;  %1082 = vmatpush.bf16.msra.mxu2 %v1035_v6  ;;  %v1067_v46 = vld [vmem:[#allocation2 + $0xa4] sm:$0xf]  ;;  %v923_v47 = vld [vmem:[#allocation2 + $0xa8] sm:$0xf0]  ;;  %v922_v49 = vor.u32 %v1068_v43, %v921_v42  ;;  %v862_v50 = vor.u32 %v1051_v44, %v859_v45  ;;  %v865_v52 = vld [vmem:[#allocation2 + $0x30] sm:$0xf] }
  0x1a   :  { %532 = vmatpush.bf16.msra.mxu1 %v1043_v7  ;;  %1090 = vmatpush.bf16.msra.mxu3 %v1043_v7  ;;  %v926_v51 = vor.u32 %v1067_v46, %v923_v47  ;;  %v1054_v53 = vld [vmem:[#allocation2 + $0x34] sm:$0xf0]  ;;  %v929_v54 = vld [vmem:[#allocation2 + $0xb0] sm:$0xf]  ;;  %v1053_v56 = vld [vmem:[#allocation2 + $0x34] sm:$0xf] }
  0x1b   :  { %v1070_v55 = vld [vmem:[#allocation2 + $0xb4] sm:$0xf0]  ;;  %v867_v57 = vld [vmem:[#allocation2 + $0x38] sm:$0xf0]  ;;  %v1069_v58 = vld [vmem:[#allocation2 + $0xb4] sm:$0xf]  ;;  %v866_v60 = vor.u32 %v1054_v53, %v865_v52 }
  0x1c   :  { %v931_v59 = vld [vmem:[#allocation2 + $0xb8] sm:$0xf0]  ;;  %v930_v61 = vor.u32 %v1070_v55, %v929_v54  ;;  %v870_v62 = vor.u32 %v1053_v56, %v867_v57  ;;  %v873_v0 = vld [vmem:[#allocation2 + $0x40] sm:$0xf]  ;;  %v1056_v1 = vld [vmem:[#allocation2 + $0x44] sm:$0xf0] }
  0x1d   :  { %444 = vmatpush.bf16.msra.mxu0 %v1034_v8  ;;  %1083 = vmatpush.bf16.msra.mxu2 %v1034_v8  ;;  %v934_v63 = vor.u32 %v1069_v58, %v931_v59  ;;  %v937_v2 = vld [vmem:[#allocation2 + $0xc0] sm:$0xf]  ;;  %v1072_v3 = vld [vmem:[#allocation2 + $0xc4] sm:$0xf0]  ;;  %v1055_v4 = vld [vmem:[#allocation2 + $0x44] sm:$0xf]  ;;  %v874_v8 = vor.u32 %v1056_v1, %v873_v0 }
  0x1e   :  { %533 = vmatpush.bf16.msra.mxu1 %v1042_v9  ;;  %1091 = vmatpush.bf16.msra.mxu3 %v1042_v9  ;;  %v875_v5 = vld [vmem:[#allocation2 + $0x48] sm:$0xf0]  ;;  %v1071_v6 = vld [vmem:[#allocation2 + $0xc4] sm:$0xf]  ;;  %v938_v9 = vor.u32 %v1072_v3, %v937_v2  ;;  %v1057_v16 = vld [vmem:[#allocation2 + $0x54] sm:$0xf] }
  0x1f   :  { %v939_v7 = vld [vmem:[#allocation2 + $0xc8] sm:$0xf0]  ;;  %v883_v17 = vld [vmem:[#allocation2 + $0x58] sm:$0xf0]  ;;  %v1073_v18 = vld [vmem:[#allocation2 + $0xd4] sm:$0xf] }
  0x20   :  { %v947_v19 = vld [vmem:[#allocation2 + $0xd8] sm:$0xf0]  ;;  %v886_v22 = vor.u32 %v1057_v16, %v883_v17  ;;  %v1059_v28 = vld [vmem:[#allocation2 + $0x64] sm:$0xf]  ;;  %v891_v29 = vld [vmem:[#allocation2 + $0x68] sm:$0xf0] }
  0x21   :  { %445 = vmatpush.bf16.msra.mxu0 %v1033_v10  ;;  %1084 = vmatpush.bf16.msra.mxu2 %v1033_v10  ;;  %v878_v10 = vor.u32 %v1055_v4, %v875_v5  ;;  %v950_v23 = vor.u32 %v1073_v18, %v947_v19  ;;  %v1075_v30 = vld [vmem:[#allocation2 + $0xe4] sm:$0xf]  ;;  %v955_v31 = vld [vmem:[#allocation2 + $0xe8] sm:$0xf0]  ;;  %v894_v34 = vor.u32 %v1059_v28, %v891_v29  ;;  %v1061_v40 = vld [vmem:[#allocation2 + $0x74] sm:$0xf] }
  0x22   :  { %534 = vmatpush.bf16.msra.mxu1 %v1041_v11  ;;  %1092 = vmatpush.bf16.msra.mxu3 %v1041_v11  ;;  %v942_v11 = vor.u32 %v1071_v6, %v939_v7  ;;  %v958_v35 = vor.u32 %v1075_v30, %v955_v31  ;;  %v899_v41 = vld [vmem:[#allocation2 + $0x78] sm:$0xf0]  ;;  %v1077_v42 = vld [vmem:[#allocation2 + $0xf4] sm:$0xf] }
  0x23   :  { %v963_v43 = vld [vmem:[#allocation2 + $0xf8] sm:$0xf0]  ;;  %v902_v46 = vor.u32 %v1061_v40, %v899_v41 }
  0x24   :  { %v966_v47 = vor.u32 %v1077_v42, %v963_v43 }
  0x25   :  { %446 = vmatpush.bf16.msra.mxu0 %v1032_v12  ;;  %1085 = vmatpush.bf16.msra.mxu2 %v1032_v12  ;;  %v881_v12 = vld [vmem:[#allocation2 + $0x50] sm:$0xf] }
  0x26   :  { %535 = vmatpush.bf16.msra.mxu1 %v1040_v13  ;;  %1093 = vmatpush.bf16.msra.mxu3 %v1040_v13  ;;  %v1058_v13 = vld [vmem:[#allocation2 + $0x54] sm:$0xf0] }
  0x27   :  { %v882_v20 = vor.u32 %v1058_v13, %v881_v12 }
  0x29   :  { %447 = vmatpush.bf16.msra.mxu0 %v1031_v14  ;;  %1086 = vmatpush.bf16.msra.mxu2 %v1031_v14  ;;  %v945_v14 = vld [vmem:[#allocation2 + $0xd0] sm:$0xf] }
  0x2a   :  { %536 = vmatpush.bf16.msra.mxu1 %v1039_v15  ;;  %1094 = vmatpush.bf16.msra.mxu3 %v1039_v15  ;;  %v1074_v15 = vld [vmem:[#allocation2 + $0xd4] sm:$0xf0] }
  0x2b   :  { %v946_v21 = vor.u32 %v1074_v15, %v945_v14 }
  0x2c   :  { %448 = vmatmul.bf16.vlgmr.msra.gmra.mxu0 %v842_v24  ;;  %488 = vmatmul.bf16.vlgmr.msra.gmra.mxu2 %v906_v25  ;;  %v889_v24 = vld [vmem:[#allocation2 + $0x60] sm:$0xf]  ;;  %v1060_v25 = vld [vmem:[#allocation2 + $0x64] sm:$0xf0] }
  0x2d   :  { %537 = vmatmul.bf16.vlgmr.msra.gmra.mxu1 %v846_v26  ;;  %577 = vmatmul.bf16.vlgmr.msra.gmra.mxu3 %v910_v27  ;;  %v953_v26 = vld [vmem:[#allocation2 + $0xe0] sm:$0xf]  ;;  %v1076_v27 = vld [vmem:[#allocation2 + $0xe4] sm:$0xf0]  ;;  %v890_v32 = vor.u32 %v1060_v25, %v889_v24 }
  0x2e   :  { %v954_v33 = vor.u32 %v1076_v27, %v953_v26 }
  0x3c   :  { %453 = vmatmul.bf16.gmra.mxu0 %v850_v36  ;;  %493 = vmatmul.bf16.gmra.mxu2 %v914_v37  ;;  %v897_v36 = vld [vmem:[#allocation2 + $0x70] sm:$0xf]  ;;  %v1062_v37 = vld [vmem:[#allocation2 + $0x74] sm:$0xf0] }
  0x3d   :  { %542 = vmatmul.bf16.gmra.mxu1 %v854_v38  ;;  %582 = vmatmul.bf16.gmra.mxu3 %v918_v39  ;;  %v961_v38 = vld [vmem:[#allocation2 + $0xf0] sm:$0xf]  ;;  %v1078_v39 = vld [vmem:[#allocation2 + $0xf4] sm:$0xf0]  ;;  %v898_v44 = vor.u32 %v1062_v37, %v897_v36 }
  0x3e   :  { %v962_v45 = vor.u32 %v1078_v39, %v961_v38 }
  0x4c   :  { %458 = vmatmul.bf16.gmra.mxu0 %v858_v48  ;;  %498 = vmatmul.bf16.gmra.mxu2 %v922_v49 }
  0x4d   :  { %547 = vmatmul.bf16.gmra.mxu1 %v862_v50  ;;  %587 = vmatmul.bf16.gmra.mxu3 %v926_v51  ;;  %v1221_v51 = vld [vmem:[%s1263_s2] ss:$0 sm:$0xff]  ;;  %s1188_s2 = smov [#allocation7]  }
  0x4e   :  { %s821_s26 = sshll.u32 %s1188_s2, 4  ;;  %s822_s26 = int_to_ptr.vmem [resolvable:$true] %s821_s26 }
  0x5c   :  { %463 = vmatmul.bf16.gmra.mxu0 %v866_v60  ;;  %503 = vmatmul.bf16.gmra.mxu2 %v930_v61 }
  0x5d   :  { %552 = vmatmul.bf16.gmra.mxu1 %v870_v62  ;;  %592 = vmatmul.bf16.gmra.mxu3 %v934_v63 }
  0x6c   :  { %468 = vmatmul.bf16.gmra.mxu0 %v874_v8  ;;  %508 = vmatmul.bf16.gmra.mxu2 %v938_v9 }
  0x6d   :  { %557 = vmatmul.bf16.gmra.mxu1 %v878_v10  ;;  %597 = vmatmul.bf16.gmra.mxu3 %v942_v11 }
  0x7c   :  { %473 = vmatmul.bf16.gmra.mxu0 %v882_v20  ;;  %513 = vmatmul.bf16.gmra.mxu2 %v946_v21 }
  0x7d   :  { %562 = vmatmul.bf16.gmra.mxu1 %v886_v22  ;;  %602 = vmatmul.bf16.gmra.mxu3 %v950_v23 }
  0x8c   :  { %478 = vmatmul.bf16.gmra.mxu0 %v890_v32  ;;  %518 = vmatmul.bf16.gmra.mxu2 %v954_v33 }
  0x8d   :  { %567 = vmatmul.bf16.gmra.mxu1 %v894_v34  ;;  %607 = vmatmul.bf16.gmra.mxu3 %v958_v35 }
  0x9c   :  { %483 = vmatmul.bf16.gmra.mxu0 %v898_v44  ;;  %523 = vmatmul.bf16.gmra.mxu2 %v962_v45 }
  0x9d   :  { %572 = vmatmul.bf16.gmra.mxu1 %v902_v46  ;;  %612 = vmatmul.bf16.gmra.mxu3 %v966_v47 }
  0xa9   :  { %v449_v48 = vpop.f32.mrf.mxu0 }
  0xaa   :  { %v538_v49 = vpop.f32.mrf.mxu1 }
  0xab   :  { %v539_v50 = vadd.f32 %v538_v49, %v449_v48 }
  0xad   :  { %v721_v52 = vadd.f32 %v1221_v51, %v539_v50 }
  0xaf   :  { %v489_v53 = vpop.f32.mrf.mxu2  ;;  %v753_v55 = vmax.f32 %v721_v52, 0.0 }
  0xb0   :  { %v578_v54 = vpop.f32.mrf.mxu3 }
  0xb1   :  { %v579_v56 = vadd.f32 %v578_v54, %v489_v53  ;;  %v451_v57 = vpop.f32.mrf.mxu0  ;;  %785 = vst [vmem:[#allocation7] sm:$0xff] %v753_v55 }
  0xb2   :  { %v540_v58 = vpop.f32.mrf.mxu1 }
  0xb3   :  { %v541_v59 = vadd.f32 %v540_v58, %v451_v57  ;;  %v737_v60 = vadd.f32 %v1221_v51, %v579_v56 }
  0xb5   :  { %v769_v61 = vmax.f32 %v737_v60, 0.0  ;;  %v722_v62 = vadd.f32 %v1221_v51, %v541_v59 }
  0xb7   :  { %v491_v63 = vpop.f32.mrf.mxu2  ;;  %801 = vst [vmem:[#allocation7 + $0x80] sm:$0xff] %v769_v61  ;;  %v754_v1 = vmax.f32 %v722_v62, 0.0 }
  0xb8   :  { %v580_v0 = vpop.f32.mrf.mxu3 }
  0xb9   :  { %v581_v2 = vadd.f32 %v580_v0, %v491_v63  ;;  %v454_v3 = vpop.f32.mrf.mxu0  ;;  %786 = vst [vmem:[#allocation7 + $0x8] sm:$0xff] %v754_v1 }
  0xba   :  { %v543_v4 = vpop.f32.mrf.mxu1 }
  0xbb   :  { %v544_v5 = vadd.f32 %v543_v4, %v454_v3  ;;  %v738_v6 = vadd.f32 %v1221_v51, %v581_v2 }
  0xbd   :  { %v770_v7 = vmax.f32 %v738_v6, 0.0  ;;  %v723_v8 = vadd.f32 %v1221_v51, %v544_v5 }
  0xbf   :  { %v494_v9 = vpop.f32.mrf.mxu2  ;;  %802 = vst [vmem:[#allocation7 + $0x88] sm:$0xff] %v770_v7  ;;  %v755_v11 = vmax.f32 %v723_v8, 0.0 }
  0xc0   :  { %v583_v10 = vpop.f32.mrf.mxu3 }
  0xc1   :  { %v584_v12 = vadd.f32 %v583_v10, %v494_v9  ;;  %v456_v13 = vpop.f32.mrf.mxu0  ;;  %787 = vst [vmem:[#allocation7 + $0x10] sm:$0xff] %v755_v11 }
  0xc2   :  { %v545_v14 = vpop.f32.mrf.mxu1 }
  0xc3   :  { %v546_v15 = vadd.f32 %v545_v14, %v456_v13  ;;  %v739_v16 = vadd.f32 %v1221_v51, %v584_v12 }
  0xc5   :  { %v771_v17 = vmax.f32 %v739_v16, 0.0  ;;  %v724_v18 = vadd.f32 %v1221_v51, %v546_v15 }
  0xc7   :  { %v496_v19 = vpop.f32.mrf.mxu2  ;;  %803 = vst [vmem:[#allocation7 + $0x90] sm:$0xff] %v771_v17  ;;  %v756_v21 = vmax.f32 %v724_v18, 0.0 }
  0xc8   :  { %v585_v20 = vpop.f32.mrf.mxu3 }
  0xc9   :  { %v586_v22 = vadd.f32 %v585_v20, %v496_v19  ;;  %v459_v23 = vpop.f32.mrf.mxu0  ;;  %788 = vst [vmem:[#allocation7 + $0x18] sm:$0xff] %v756_v21 }
  0xca   :  { %v548_v24 = vpop.f32.mrf.mxu1 }
  0xcb   :  { %v549_v25 = vadd.f32 %v548_v24, %v459_v23  ;;  %v740_v26 = vadd.f32 %v1221_v51, %v586_v22 }
  0xcd   :  { %v772_v27 = vmax.f32 %v740_v26, 0.0  ;;  %v725_v28 = vadd.f32 %v1221_v51, %v549_v25 }
  0xcf   :  { %v499_v29 = vpop.f32.mrf.mxu2  ;;  %804 = vst [vmem:[#allocation7 + $0x98] sm:$0xff] %v772_v27  ;;  %v757_v31 = vmax.f32 %v725_v28, 0.0 }
  0xd0   :  { %v588_v30 = vpop.f32.mrf.mxu3 }
  0xd1   :  { %v589_v32 = vadd.f32 %v588_v30, %v499_v29  ;;  %v461_v33 = vpop.f32.mrf.mxu0  ;;  %789 = vst [vmem:[#allocation7 + $0x20] sm:$0xff] %v757_v31 }
  0xd2   :  { %v550_v34 = vpop.f32.mrf.mxu1 }
  0xd3   :  { %v551_v35 = vadd.f32 %v550_v34, %v461_v33  ;;  %v741_v36 = vadd.f32 %v1221_v51, %v589_v32 }
  0xd5   :  { %v773_v37 = vmax.f32 %v741_v36, 0.0  ;;  %v726_v38 = vadd.f32 %v1221_v51, %v551_v35 }
  0xd7   :  { %v501_v39 = vpop.f32.mrf.mxu2  ;;  %805 = vst [vmem:[#allocation7 + $0xa0] sm:$0xff] %v773_v37  ;;  %v758_v41 = vmax.f32 %v726_v38, 0.0 }
  0xd8   :  { %v590_v40 = vpop.f32.mrf.mxu3 }
  0xd9   :  { %v591_v42 = vadd.f32 %v590_v40, %v501_v39  ;;  %v464_v43 = vpop.f32.mrf.mxu0  ;;  %790 = vst [vmem:[#allocation7 + $0x28] sm:$0xff] %v758_v41 }
  0xda   :  { %v553_v44 = vpop.f32.mrf.mxu1 }
  0xdb   :  { %v554_v45 = vadd.f32 %v553_v44, %v464_v43  ;;  %v742_v46 = vadd.f32 %v1221_v51, %v591_v42 }
  0xdd   :  { %v774_v47 = vmax.f32 %v742_v46, 0.0  ;;  %v727_v48 = vadd.f32 %v1221_v51, %v554_v45 }
  0xdf   :  { %v504_v49 = vpop.f32.mrf.mxu2  ;;  %806 = vst [vmem:[#allocation7 + $0xa8] sm:$0xff] %v774_v47  ;;  %v759_v52 = vmax.f32 %v727_v48, 0.0 }
  0xe0   :  { %v593_v50 = vpop.f32.mrf.mxu3 }
  0xe1   :  { %v594_v53 = vadd.f32 %v593_v50, %v504_v49  ;;  %v466_v54 = vpop.f32.mrf.mxu0  ;;  %791 = vst [vmem:[#allocation7 + $0x30] sm:$0xff] %v759_v52 }
  0xe2   :  { %v555_v55 = vpop.f32.mrf.mxu1 }
  0xe3   :  { %v556_v56 = vadd.f32 %v555_v55, %v466_v54  ;;  %v743_v57 = vadd.f32 %v1221_v51, %v594_v53 }
  0xe5   :  { %v775_v58 = vmax.f32 %v743_v57, 0.0  ;;  %v728_v59 = vadd.f32 %v1221_v51, %v556_v56 }
  0xe7   :  { %v506_v60 = vpop.f32.mrf.mxu2  ;;  %807 = vst [vmem:[#allocation7 + $0xb0] sm:$0xff] %v775_v58  ;;  %v760_v62 = vmax.f32 %v728_v59, 0.0 }
  0xe8   :  { %v595_v61 = vpop.f32.mrf.mxu3 }
  0xe9   :  { %v596_v63 = vadd.f32 %v595_v61, %v506_v60  ;;  %v469_v0 = vpop.f32.mrf.mxu0  ;;  %792 = vst [vmem:[#allocation7 + $0x38] sm:$0xff] %v760_v62 }
  0xea   :  { %v558_v1 = vpop.f32.mrf.mxu1 }
  0xeb   :  { %v559_v2 = vadd.f32 %v558_v1, %v469_v0  ;;  %v744_v3 = vadd.f32 %v1221_v51, %v596_v63 }
  0xed   :  { %v776_v4 = vmax.f32 %v744_v3, 0.0  ;;  %v729_v5 = vadd.f32 %v1221_v51, %v559_v2 }
  0xef   :  { %v509_v6 = vpop.f32.mrf.mxu2  ;;  %808 = vst [vmem:[#allocation7 + $0xb8] sm:$0xff] %v776_v4  ;;  %v761_v8 = vmax.f32 %v729_v5, 0.0 }
  0xf0   :  { %v598_v7 = vpop.f32.mrf.mxu3 }
  0xf1   :  { %v599_v9 = vadd.f32 %v598_v7, %v509_v6  ;;  %v471_v10 = vpop.f32.mrf.mxu0  ;;  %793 = vst [vmem:[#allocation7 + $0x40] sm:$0xff] %v761_v8 }
  0xf2   :  { %v560_v11 = vpop.f32.mrf.mxu1 }
  0xf3   :  { %v561_v12 = vadd.f32 %v560_v11, %v471_v10  ;;  %v745_v13 = vadd.f32 %v1221_v51, %v599_v9 }
  0xf5   :  { %v777_v14 = vmax.f32 %v745_v13, 0.0  ;;  %v730_v15 = vadd.f32 %v1221_v51, %v561_v12 }
  0xf7   :  { %v511_v16 = vpop.f32.mrf.mxu2  ;;  %809 = vst [vmem:[#allocation7 + $0xc0] sm:$0xff] %v777_v14  ;;  %v762_v18 = vmax.f32 %v730_v15, 0.0 }
  0xf8   :  { %v600_v17 = vpop.f32.mrf.mxu3 }
  0xf9   :  { %v601_v19 = vadd.f32 %v600_v17, %v511_v16  ;;  %v474_v20 = vpop.f32.mrf.mxu0  ;;  %794 = vst [vmem:[#allocation7 + $0x48] sm:$0xff] %v762_v18 }
  0xfa   :  { %v563_v21 = vpop.f32.mrf.mxu1 }
  0xfb   :  { %v564_v22 = vadd.f32 %v563_v21, %v474_v20  ;;  %v746_v23 = vadd.f32 %v1221_v51, %v601_v19 }
  0xfd   :  { %v778_v24 = vmax.f32 %v746_v23, 0.0  ;;  %v731_v25 = vadd.f32 %v1221_v51, %v564_v22 }
  0xff   :  { %v514_v26 = vpop.f32.mrf.mxu2  ;;  %810 = vst [vmem:[#allocation7 + $0xc8] sm:$0xff] %v778_v24  ;;  %v763_v28 = vmax.f32 %v731_v25, 0.0 }
 0x100   :  { %v603_v27 = vpop.f32.mrf.mxu3 }
 0x101   :  { %v604_v29 = vadd.f32 %v603_v27, %v514_v26  ;;  %v476_v30 = vpop.f32.mrf.mxu0  ;;  %795 = vst [vmem:[#allocation7 + $0x50] sm:$0xff] %v763_v28 }
 0x102   :  { %v565_v31 = vpop.f32.mrf.mxu1 }
 0x103   :  { %v566_v32 = vadd.f32 %v565_v31, %v476_v30  ;;  %v747_v33 = vadd.f32 %v1221_v51, %v604_v29 }
 0x105   :  { %v779_v34 = vmax.f32 %v747_v33, 0.0  ;;  %v732_v35 = vadd.f32 %v1221_v51, %v566_v32 }
 0x107   :  { %v516_v36 = vpop.f32.mrf.mxu2  ;;  %811 = vst [vmem:[#allocation7 + $0xd0] sm:$0xff] %v779_v34  ;;  %v764_v38 = vmax.f32 %v732_v35, 0.0 }
 0x108   :  { %v605_v37 = vpop.f32.mrf.mxu3 }
 0x109   :  { %v606_v39 = vadd.f32 %v605_v37, %v516_v36  ;;  %v479_v40 = vpop.f32.mrf.mxu0  ;;  %796 = vst [vmem:[#allocation7 + $0x58] sm:$0xff] %v764_v38 }
 0x10a   :  { %v568_v41 = vpop.f32.mrf.mxu1 }
 0x10b   :  { %v569_v42 = vadd.f32 %v568_v41, %v479_v40  ;;  %v748_v43 = vadd.f32 %v1221_v51, %v606_v39 }
 0x10d   :  { %v780_v44 = vmax.f32 %v748_v43, 0.0  ;;  %v733_v45 = vadd.f32 %v1221_v51, %v569_v42 }
 0x10f   :  { %v519_v46 = vpop.f32.mrf.mxu2  ;;  %812 = vst [vmem:[#allocation7 + $0xd8] sm:$0xff] %v780_v44  ;;  %v765_v48 = vmax.f32 %v733_v45, 0.0 }
 0x110   :  { %v608_v47 = vpop.f32.mrf.mxu3 }
 0x111   :  { %v609_v49 = vadd.f32 %v608_v47, %v519_v46  ;;  %v481_v50 = vpop.f32.mrf.mxu0  ;;  %797 = vst [vmem:[#allocation7 + $0x60] sm:$0xff] %v765_v48 }
 0x112   :  { %v570_v52 = vpop.f32.mrf.mxu1 }
 0x113   :  { %v571_v53 = vadd.f32 %v570_v52, %v481_v50  ;;  %v749_v54 = vadd.f32 %v1221_v51, %v609_v49 }
 0x115   :  { %v781_v55 = vmax.f32 %v749_v54, 0.0  ;;  %v734_v56 = vadd.f32 %v1221_v51, %v571_v53 }
 0x117   :  { %v521_v57 = vpop.f32.mrf.mxu2  ;;  %813 = vst [vmem:[#allocation7 + $0xe0] sm:$0xff] %v781_v55  ;;  %v766_v59 = vmax.f32 %v734_v56, 0.0 }
 0x118   :  { %v610_v58 = vpop.f32.mrf.mxu3 }
 0x119   :  { %v611_v60 = vadd.f32 %v610_v58, %v521_v57  ;;  %v484_v61 = vpop.f32.mrf.mxu0  ;;  %798 = vst [vmem:[#allocation7 + $0x68] sm:$0xff] %v766_v59 }
 0x11a   :  { %v573_v62 = vpop.f32.mrf.mxu1 }
 0x11b   :  { %v574_v63 = vadd.f32 %v573_v62, %v484_v61  ;;  %v750_v0 = vadd.f32 %v1221_v51, %v611_v60 }
 0x11d   :  { %v782_v1 = vmax.f32 %v750_v0, 0.0  ;;  %v735_v2 = vadd.f32 %v1221_v51, %v574_v63 }
 0x11f   :  { %v524_v3 = vpop.f32.mrf.mxu2  ;;  %814 = vst [vmem:[#allocation7 + $0xe8] sm:$0xff] %v782_v1  ;;  %v767_v5 = vmax.f32 %v735_v2, 0.0 }
 0x120   :  { %v613_v4 = vpop.f32.mrf.mxu3 }
 0x121   :  { %v614_v6 = vadd.f32 %v613_v4, %v524_v3  ;;  %v486_v7 = vpop.f32.mrf.mxu0  ;;  %799 = vst [vmem:[#allocation7 + $0x70] sm:$0xff] %v767_v5 }
 0x122   :  { %v575_v8 = vpop.f32.mrf.mxu1 }
 0x123   :  { %v576_v9 = vadd.f32 %v575_v8, %v486_v7  ;;  %v751_v10 = vadd.f32 %v1221_v51, %v614_v6 }
 0x125   :  { %v783_v11 = vmax.f32 %v751_v10, 0.0  ;;  %v736_v12 = vadd.f32 %v1221_v51, %v576_v9 }
 0x127   :  { %v526_v13 = vpop.f32.mrf.mxu2  ;;  %815 = vst [vmem:[#allocation7 + $0xf0] sm:$0xff] %v783_v11  ;;  %v768_v15 = vmax.f32 %v736_v12, 0.0 }
 0x128   :  { %v615_v14 = vpop.f32.mrf.mxu3 }
 0x129   :  { %v616_v16 = vadd.f32 %v615_v14, %v526_v13  ;;  %800 = vst [vmem:[#allocation7 + $0x78] sm:$0xff] %v768_v15 }
 0x12b   :  { %v752_v17 = vadd.f32 %v1221_v51, %v616_v16 }
 0x12d   :  { %v784_v18 = vmax.f32 %v752_v17, 0.0 }
 0x12f   :  { %816 = vst [vmem:[#allocation7 + $0xf8] sm:$0xff] %v784_v18 }
 0x130   :  { %829 = dma.vmem_to_hbm [thread:$0]  %s822_s26, 4096, %s824_s29, [#allocation4], %s1183_s20, %s1183_s20, %s1184_s21  }
 0x131   :  { %1180 = dma.done.wait [#allocation4], 4096  }
 0x132   :  { %1181 = vsyncadd [#allocation4], 4294963200 }
 0x133   :  { %834 = vsyncpa [#allocation3], 1 }
 0x134   :  { %835 = vsyncpa [#allocation6], 1 }
 0x135   :  { %836 = vsyncpa [#allocation4], 1 }

</bundles_post_ra>
